<compile_context>
chip_gen: v5e
topology: v5e:2x2
jax: 0.10.0
libtpu: 0.0.40
codegen_flags: <defaults>
</compile_context>

<pallas_src>
import jax
import jax.numpy as jnp
from jax.experimental import pallas as pl
from jax.experimental.pallas import tpu as pltpu


def _round_up(x, m):
    return ((x + m - 1) // m) * m


def event_encoder_kernel(x_ref, wf_ref, bf_ref, w1_ref, b1_ref,
                         w2_ref, b2_ref, out_ref):
    x = x_ref[...]                                   # (tb, 3) = [time, x, y]

    # Fused front layer (temporal + spatial) on the VPU: three broadcast FMAs
    # over (tb, 2*Hp) instead of two K<=2 MXU matmuls.
    emb = (x[:, 0:1] * wf_ref[0:1, :] +
           x[:, 1:2] * wf_ref[1:2, :] +
           x[:, 2:3] * wf_ref[2:3, :] +
           bf_ref[...])
    emb = jnp.maximum(emb, 0.0)                      # (tb, 2*Hp)

    # encoder layer 1: (tb, 2Hp) @ (2Hp, Hp) + b1 -> relu   (MXU)
    h = jnp.dot(emb, w1_ref[...],
                preferred_element_type=jnp.float32) + b1_ref[...]
    h = jnp.maximum(h, 0.0)

    # encoder layer 2: (tb, Hp) @ (Hp, Dp) + b2              (MXU)
    out = jnp.dot(h, w2_ref[...],
                  preferred_element_type=jnp.float32) + b2_ref[...]
    out_ref[...] = out.astype(out_ref.dtype)


def pack_params(p):
    """Fuse + lane-pad the PyTorch-layout params for the kernel.

    Front layer weight is block diagonal over [time | state]:
      columns [0:Hp)   -> emb_time   (only row 0 / wt contributes)
      columns [Hp:2Hp) -> emb_state  (rows 1,2 / ws contribute)
    All padding is zeros, so padded lanes stay exactly zero through relu and
    contribute nothing downstream.
    """
    H = p["ws"].shape[1]
    D = p["w2"].shape[1]
    hp = _round_up(H, 128)                           # lane-dense hidden
    dp = _round_up(D, 128)                           # lane-dense head / output

    wf = jnp.zeros((3, 2 * hp), jnp.float32)
    wf = wf.at[0, :H].set(p["wt"][0])                # time  -> emb_time
    wf = wf.at[1, hp:hp + H].set(p["ws"][0])         # x     -> emb_state
    wf = wf.at[2, hp:hp + H].set(p["ws"][1])         # y     -> emb_state
    bf = jnp.zeros((1, 2 * hp), jnp.float32)
    bf = bf.at[0, :H].set(p["bt"][0])
    bf = bf.at[0, hp:hp + H].set(p["bs"][0])

    w1 = jnp.zeros((2 * hp, hp), jnp.float32)
    w1 = w1.at[:H, :H].set(p["w1t"])                 # emb_time rows
    w1 = w1.at[hp:hp + H, :H].set(p["w1s"])          # emb_state rows
    b1 = jnp.zeros((1, hp), jnp.float32).at[0, :H].set(p["b1"][0])

    w2 = jnp.zeros((hp, dp), jnp.float32).at[:H, :D].set(p["w2"])
    b2 = jnp.zeros((1, dp), jnp.float32).at[0, :D].set(p["b2"][0])

    return {"wf": wf, "bf": bf, "w1": w1, "b1": b1, "w2": w2, "b2": b2}


def event_encoder(state, time, params, *, num_blocks=1):
    """state: (N, 2) f32, time: (N, 1) f32 -> (N, head_dim) f32.

    num_blocks=1 (grid collapses to a single step) is best on v5e/v6e;
    num_blocks=2 with the "parallel" axis shards the batch across v7x's two
    TensorCores.
    """
    N = state.shape[0]
    D = params["w2"].shape[1]

    kp = pack_params(params)
    hp2 = kp["wf"].shape[1]     # 2 * Hp
    hp = kp["w1"].shape[1]      # Hp
    dp = kp["w2"].shape[1]      # Dp

    # Single fused input [time, x, y]; pad the batch to sublane alignment.
    x = jnp.concatenate([time, state], axis=-1)      # (N, 3)
    align = 8 * num_blocks
    n_pad = (-N) % align
    if n_pad:
        x = jnp.pad(x, ((0, n_pad), (0, 0)))
    np_ = N + n_pad
    tb = np_ // num_blocks

    flops = 2 * np_ * (3 * hp2 + hp2 * hp + hp * dp)
    bytes_accessed = 4 * (np_ * 3 + 3 * hp2 + hp2 + hp2 * hp + hp
                          + hp * dp + dp + np_ * dp)

    full = lambda i: (0, 0)
    out = pl.pallas_call(
        event_encoder_kernel,
        out_shape=jax.ShapeDtypeStruct((np_, dp), jnp.float32),
        grid_spec=pl.GridSpec(
            grid=(num_blocks,),
            in_specs=[
                pl.BlockSpec((tb, 3), lambda i: (i, 0)),   # fused input tile
                pl.BlockSpec((3, hp2), full),              # fused front weight
                pl.BlockSpec((1, hp2), full),              # fused front bias
                pl.BlockSpec((hp2, hp), full),             # W1
                pl.BlockSpec((1, hp), full),               # b1
                pl.BlockSpec((hp, dp), full),              # W2
                pl.BlockSpec((1, dp), full),               # b2
            ],
            out_specs=pl.BlockSpec((tb, dp), lambda i: (i, 0)),
        ),
        compiler_params=pltpu.CompilerParams(
            dimension_semantics=("parallel",)),
        cost_estimate=pl.CostEstimate(flops=flops, transcendentals=0,
                                      bytes_accessed=bytes_accessed),
    )(x, kp["wf"], kp["bf"], kp["w1"], kp["b1"], kp["w2"], kp["b2"])

    # Slice off batch padding and lane padding.
    return out[:N, :D]


def init_params(key, hidden_dim, head_dim):
    """Deterministic synthetic parameters (shapes match the PyTorch module,
    stored pre-transposed as (in, out))."""
    ks = jax.random.split(key, 9)

    def uniform(k, shape, fan_in):
        bound = 1.0 / (fan_in ** 0.5)
        return jax.random.uniform(k, shape, jnp.float32, -bound, bound)

    H, D = hidden_dim, head_dim
    return {
        # spatial: Linear(2, H)
        "ws": uniform(ks[0], (2, H), 2),
        "bs": uniform(ks[1], (1, H), 2),
        # temporal: Linear(1, H)
        "wt": uniform(ks[2], (1, H), 1),
        "bt": uniform(ks[3], (1, H), 1),
        # encoder layer 1: Linear(2H, H), split into time half / state half
        "w1t": uniform(ks[4], (H, H), 2 * H),
        "w1s": uniform(ks[5], (H, H), 2 * H),
        "b1": uniform(ks[6], (1, H), 2 * H),
        # encoder layer 2: Linear(H, D)
        "w2": uniform(ks[7], (H, D), H),
        "b2": uniform(ks[8], (1, D), H),
    }


def event_encoder_ref(state, time, p):
    """Pure-JAX reference of the PyTorch forward."""
    emb_state = jax.nn.relu(state @ p["ws"] + p["bs"])
    emb_time = jax.nn.relu(time @ p["wt"] + p["bt"])
    cat = jnp.concatenate([emb_time, emb_state], axis=-1)
    w1 = jnp.concatenate([p["w1t"], p["w1s"]], axis=0)
    h = jax.nn.relu(cat @ w1 + p["b1"])
    return h @ p["w2"] + p["b2"]


if __name__ == "__main__":
    hidden_dim, head_dim = 32, 8
    N = 16  # number of sampled events (batch)

    key = jax.random.PRNGKey(0)
    k_state, k_time, k_param = jax.random.split(key, 3)

    state = jax.random.normal(k_state, (N, 2), jnp.float32)   # (x, y) locations
    time = jax.random.normal(k_time, (N, 1), jnp.float32)     # times

    params = init_params(k_param, hidden_dim, head_dim)

    out = event_encoder(state, time, params)
    out = jax.block_until_ready(out)

    ref = event_encoder_ref(state, time, params)
    assert out.shape == (N, head_dim)
    assert jnp.allclose(out, ref, atol=1e-5, rtol=1e-5)

    print("KERNEL_OK")
</pallas_src>

<mosaic_0001>
module attributes {stable_mosaic.version = 11 : i64} {
  func.func @event_encoder_kernel(%arg0: i32, %arg1: memref<16x3xf32, #tpu.memory_space<vmem>>, %arg2: memref<3x256xf32, #tpu.memory_space<vmem>>, %arg3: memref<1x256xf32, #tpu.memory_space<vmem>>, %arg4: memref<256x128xf32, #tpu.memory_space<vmem>>, %arg5: memref<1x128xf32, #tpu.memory_space<vmem>>, %arg6: memref<128x128xf32, #tpu.memory_space<vmem>>, %arg7: memref<1x128xf32, #tpu.memory_space<vmem>>, %arg8: memref<16x128xf32, #tpu.memory_space<vmem>>) attributes {dimension_semantics = [#tpu.dimension_semantics<parallel>], iteration_bounds = array<i64: 1>, scalar_prefetch = 0 : i64, scratch_operands = 0 : i64, tpu.core_type = #tpu.core_type<tc>, window_params = [{transform_indices = @transform_0, window_bounds = array<i64: 16, 3>}, {pipeline_mode = #tpu.pipeline_mode<synchronous>, transform_indices = @transform_1, window_bounds = array<i64: 3, 256>}, {pipeline_mode = #tpu.pipeline_mode<synchronous>, transform_indices = @transform_2, window_bounds = array<i64: 1, 256>}, {pipeline_mode = #tpu.pipeline_mode<synchronous>, transform_indices = @transform_3, window_bounds = array<i64: 256, 128>}, {pipeline_mode = #tpu.pipeline_mode<synchronous>, transform_indices = @transform_4, window_bounds = array<i64: 1, 128>}, {pipeline_mode = #tpu.pipeline_mode<synchronous>, transform_indices = @transform_5, window_bounds = array<i64: 128, 128>}, {pipeline_mode = #tpu.pipeline_mode<synchronous>, transform_indices = @transform_6, window_bounds = array<i64: 1, 128>}, {transform_indices = @transform_7, window_bounds = array<i64: 16, 128>}]} {
    %c0 = arith.constant 0 : index
    %c0_0 = arith.constant 0 : index
    %0 = vector.load %arg1[%c0, %c0_0] : memref<16x3xf32, #tpu.memory_space<vmem>>, vector<16x3xf32>
    %1 = vector.extract_strided_slice %0 {offsets = [0, 0], sizes = [16, 1], strides = [1, 1]} : vector<16x3xf32> to vector<16x1xf32>
    %c0_1 = arith.constant 0 : index
    %c0_2 = arith.constant 0 : index
    %2 = vector.load %arg2[%c0_1, %c0_2] : memref<3x256xf32, #tpu.memory_space<vmem>>, vector<1x256xf32>
    %3 = vector.broadcast %1 : vector<16x1xf32> to vector<16x256xf32>
    %4 = vector.broadcast %2 : vector<1x256xf32> to vector<16x256xf32>
    %5 = arith.mulf %3, %4 : vector<16x256xf32>
    %6 = vector.extract_strided_slice %0 {offsets = [0, 1], sizes = [16, 1], strides = [1, 1]} : vector<16x3xf32> to vector<16x1xf32>
    %c1 = arith.constant 1 : index
    %c0_3 = arith.constant 0 : index
    %7 = vector.load %arg2[%c1, %c0_3] : memref<3x256xf32, #tpu.memory_space<vmem>>, vector<1x256xf32>
    %8 = vector.broadcast %6 : vector<16x1xf32> to vector<16x256xf32>
    %9 = vector.broadcast %7 : vector<1x256xf32> to vector<16x256xf32>
    %10 = arith.mulf %8, %9 : vector<16x256xf32>
    %11 = arith.addf %5, %10 : vector<16x256xf32>
    %12 = vector.extract_strided_slice %0 {offsets = [0, 2], sizes = [16, 1], strides = [1, 1]} : vector<16x3xf32> to vector<16x1xf32>
    %c2 = arith.constant 2 : index
    %c0_4 = arith.constant 0 : index
    %13 = vector.load %arg2[%c2, %c0_4] : memref<3x256xf32, #tpu.memory_space<vmem>>, vector<1x256xf32>
    %14 = vector.broadcast %12 : vector<16x1xf32> to vector<16x256xf32>
    %15 = vector.broadcast %13 : vector<1x256xf32> to vector<16x256xf32>
    %16 = arith.mulf %14, %15 : vector<16x256xf32>
    %17 = arith.addf %11, %16 : vector<16x256xf32>
    %c0_5 = arith.constant 0 : index
    %c0_6 = arith.constant 0 : index
    %18 = vector.load %arg3[%c0_5, %c0_6] : memref<1x256xf32, #tpu.memory_space<vmem>>, vector<1x256xf32>
    %19 = vector.broadcast %18 : vector<1x256xf32> to vector<16x256xf32>
    %20 = arith.addf %17, %19 : vector<16x256xf32>
    %cst = arith.constant 0.000000e+00 : f32
    %21 = vector.broadcast %cst : f32 to vector<16x256xf32>
    %22 = arith.maximumf %20, %21 : vector<16x256xf32>
    %c0_7 = arith.constant 0 : index
    %c0_8 = arith.constant 0 : index
    %23 = vector.load %arg4[%c0_7, %c0_8] : memref<256x128xf32, #tpu.memory_space<vmem>>, vector<256x128xf32>
    %cst_9 = arith.constant dense<0.000000e+00> : vector<16x128xf32>
    %24 = tpu.matmul %22, %23, %cst_9 {dimension_numbers = #tpu.dot_dimension_numbers<[1], [0], [0], [1], [0, 0, 1, 1], [], []>} : vector<16x256xf32>, vector<256x128xf32>, vector<16x128xf32> -> vector<16x128xf32>
    %c0_10 = arith.constant 0 : index
    %c0_11 = arith.constant 0 : index
    %25 = vector.load %arg5[%c0_10, %c0_11] : memref<1x128xf32, #tpu.memory_space<vmem>>, vector<1x128xf32>
    %26 = vector.broadcast %25 : vector<1x128xf32> to vector<16x128xf32>
    %27 = arith.addf %24, %26 : vector<16x128xf32>
    %cst_12 = arith.constant 0.000000e+00 : f32
    %28 = vector.broadcast %cst_12 : f32 to vector<16x128xf32>
    %29 = arith.maximumf %27, %28 : vector<16x128xf32>
    %c0_13 = arith.constant 0 : index
    %c0_14 = arith.constant 0 : index
    %30 = vector.load %arg6[%c0_13, %c0_14] : memref<128x128xf32, #tpu.memory_space<vmem>>, vector<128x128xf32>
    %cst_15 = arith.constant dense<0.000000e+00> : vector<16x128xf32>
    %31 = tpu.matmul %29, %30, %cst_15 {dimension_numbers = #tpu.dot_dimension_numbers<[1], [0], [0], [1], [0, 0, 1, 1], [], []>} : vector<16x128xf32>, vector<128x128xf32>, vector<16x128xf32> -> vector<16x128xf32>
    %c0_16 = arith.constant 0 : index
    %c0_17 = arith.constant 0 : index
    %32 = vector.load %arg7[%c0_16, %c0_17] : memref<1x128xf32, #tpu.memory_space<vmem>>, vector<1x128xf32>
    %33 = vector.broadcast %32 : vector<1x128xf32> to vector<16x128xf32>
    %34 = arith.addf %31, %33 : vector<16x128xf32>
    %c0_18 = arith.constant 0 : index
    %c0_19 = arith.constant 0 : index
    %35 = vector.load %arg8[%c0_18, %c0_19] : memref<16x128xf32, #tpu.memory_space<vmem>>, vector<16x128xf32>
    tpu.vector_store %arg8[%c0_18, %c0_19], %34 {strides = array<i32>} : memref<16x128xf32, #tpu.memory_space<vmem>>, vector<16x128xf32>,
    return
  }
  func.func @transform_0(%arg0: i32) -> (i32, i32) {
    %c0_i32 = arith.constant 0 : i32
    %c0_i32_0 = arith.constant 0 : i32
    return %arg0, %c0_i32 : i32, i32
  }
  func.func @transform_1(%arg0: i32) -> (i32, i32) {
    %c0_i32 = arith.constant 0 : i32
    %c0_i32_0 = arith.constant 0 : i32
    %c0_i32_1 = arith.constant 0 : i32
    return %c0_i32, %c0_i32_0 : i32, i32
  }
  func.func @transform_2(%arg0: i32) -> (i32, i32) {
    %c0_i32 = arith.constant 0 : i32
    %c0_i32_0 = arith.constant 0 : i32
    %c0_i32_1 = arith.constant 0 : i32
    return %c0_i32, %c0_i32_0 : i32, i32
  }
  func.func @transform_3(%arg0: i32) -> (i32, i32) {
    %c0_i32 = arith.constant 0 : i32
    %c0_i32_0 = arith.constant 0 : i32
    %c0_i32_1 = arith.constant 0 : i32
    return %c0_i32, %c0_i32_0 : i32, i32
  }
  func.func @transform_4(%arg0: i32) -> (i32, i32) {
    %c0_i32 = arith.constant 0 : i32
    %c0_i32_0 = arith.constant 0 : i32
    %c0_i32_1 = arith.constant 0 : i32
    return %c0_i32, %c0_i32_0 : i32, i32
  }
  func.func @transform_5(%arg0: i32) -> (i32, i32) {
    %c0_i32 = arith.constant 0 : i32
    %c0_i32_0 = arith.constant 0 : i32
    %c0_i32_1 = arith.constant 0 : i32
    return %c0_i32, %c0_i32_0 : i32, i32
  }
  func.func @transform_6(%arg0: i32) -> (i32, i32) {
    %c0_i32 = arith.constant 0 : i32
    %c0_i32_0 = arith.constant 0 : i32
    %c0_i32_1 = arith.constant 0 : i32
    return %c0_i32, %c0_i32_0 : i32, i32
  }
  func.func @transform_7(%arg0: i32) -> (i32, i32) {
    %c0_i32 = arith.constant 0 : i32
    %c0_i32_0 = arith.constant 0 : i32
    return %arg0, %c0_i32 : i32, i32
  }
}

</mosaic_0001>

<bundles_post_ra>
// kernel: tpu_custom_call.1
= control target key start
LH: loop header
LB: loop body
LE: loop exit
PB: predicated region body
PF: predicated region fallthrough
CT: control target
= control target key end

     0   :  { %12 = vsyncpa [#allocation3], 0  ;;  %s492_s0 = inlined_call_operand.vmem [shape: f32[16,3], index: 0, kind: input, shape index: {}]   ;;  %s493_s1 = inlined_call_operand.vmem [shape: f32[3,256], index: 1, kind: input, shape index: {}]   ;;  %s494_s2 = inlined_call_operand.vmem [shape: f32[1,256], index: 2, kind: input, shape index: {}]   ;;  %s495_s3 = inlined_call_operand.hbm [shape: f32[256,128], index: 3, kind: input, shape index: {}]   ;;  %s496_s4 = inlined_call_operand.vmem [shape: f32[1,128], index: 4, kind: input, shape index: {}]   ;;  %s497_s5 = inlined_call_operand.hbm [shape: f32[128,128], index: 5, kind: input, shape index: {}]   ;;  %s498_s6 = inlined_call_operand.vmem [shape: f32[1,128], index: 6, kind: input, shape index: {}]   ;;  %s499_s7 = inlined_call_operand.hbm [shape: f32[16,128], index: 7, kind: output, shape index: {}]  }
   0x1   :  { %13 = vsyncpa [#allocation6], 0 }
   0x2   :  { %14 = vsyncpa [#allocation4], 0  ;;  %s25_s26 = sshll.u32 %s495_s3, 4  ;;  %s402_s27 = smov [#allocation2]   ;;  %s26_s26 = int_to_ptr.hbm [resolvable:$true] %s25_s26 }
   0x3   :  { %s27_s28 = sshll.u32 %s402_s27, 4  ;;  %s40_s8 = sshll.u32 %s497_s5, 4  ;;  %s28_s28 = int_to_ptr.vmem [resolvable:$true] %s27_s28  ;;  %s41_s8 = int_to_ptr.hbm [resolvable:$true] %s40_s8 }
   0x4   :  { %s403_s9 = smov 128   ;;  %s404_s10 = smov 8  }
   0x5   :  { %33 = dma.hbm_to_vmem [thread:$0]  %s26_s26, 4096, %s28_s28, [#allocation3], %s403_s9, %s403_s9, %s404_s10  }
   0x6   :  { %s405_s11 = smov [#allocation5]  }
   0x7   :  { %s42_s12 = sshll.u32 %s405_s11, 4  ;;  %s43_s12 = int_to_ptr.vmem [resolvable:$true] %s42_s12 }
   0x8   :  { %48 = dma.hbm_to_vmem [thread:$0]  %s41_s8, 2048, %s43_s12, [#allocation6], %s403_s9, %s403_s9, %s404_s10  }
   0x9   :  { %396 = dma.done.wait [#allocation3], 4096  }
   0xa   :  { %397 = vsyncadd [#allocation3], 4294963200 }
   0xb   :  { %398 = dma.done.wait [#allocation6], 2048  }
   0xc   :  { %399 = vsyncadd [#allocation6], 4294965248  ;;  %v406_v0 = vmov 0   ;;  %v407_v1 = vmov 2   ;;  %v60_v2 = vld [vmem:[%s492_s0 + $0x8] sm:$0xff]  ;;  %v59_v3 = vld [vmem:[%s492_s0] sm:$0xff] }
   0xd   :  { %318 = vset.pattern.permute.xlu1 %v406_v0  ;;  %316 = vset.pattern.permute.xlu0 %v406_v0  ;;  %v156_v4 = vld [vmem:[#allocation2 + $0x78] sm:$0xff]  ;;  %v155_v6 = vld [vmem:[#allocation2 + $0x70] sm:$0xff]  ;;  %v154_v8 = vld [vmem:[#allocation2 + $0x68] sm:$0xff]  ;;  %v408_v11 = vmov 1   ;;  %s276_s27 = sshll.u32 %s499_s7, 4  ;;  %s277_s27 = int_to_ptr.hbm [resolvable:$true] %s276_s27 }
   0xe   :  { %320 = vset.pattern.permute.xlu2 %v407_v1  ;;  %69 = vperm.xlu1 %318, %v60_v2   ;;  %v172_v5 = vld [vmem:[#allocation2 + $0xf8] sm:$0xff]  ;;  %v171_v7 = vld [vmem:[#allocation2 + $0xf0] sm:$0xff]  ;;  %v170_v9 = vld [vmem:[#allocation2 + $0xe8] sm:$0xff] }
   0xf   :  { %64 = vperm.xlu0 %316, %v59_v3   ;;  %107 = vperm.xlu2 %320, %v59_v3   ;;  %v153_v10 = vld [vmem:[#allocation2 + $0x60] sm:$0xff]  ;;  %v152_v13 = vld [vmem:[#allocation2 + $0x58] sm:$0xff]  ;;  %v151_v15 = vld [vmem:[#allocation2 + $0x50] sm:$0xff] }
  0x10   :  { %177 = vmatpush.msra.mxu0 %v156_v4  ;;  %292 = vmatpush.msra.mxu3 %v156_v4  ;;  %v169_v12 = vld [vmem:[#allocation2 + $0xe0] sm:$0xff]  ;;  %v168_v14 = vld [vmem:[#allocation2 + $0xd8] sm:$0xff]  ;;  %v167_v16 = vld [vmem:[#allocation2 + $0xd0] sm:$0xff] }
  0x11   :  { %200 = vmatpush.msra.mxu1 %v172_v5  ;;  %v150_v17 = vld [vmem:[#allocation2 + $0x48] sm:$0xff]  ;;  %v149_v19 = vld [vmem:[#allocation2 + $0x40] sm:$0xff]  ;;  %v148_v21 = vld [vmem:[#allocation2 + $0x38] sm:$0xff] }
  0x12   :  { %178 = vmatpush.msra.mxu0 %v155_v6  ;;  %293 = vmatpush.msra.mxu3 %v155_v6  ;;  %v166_v18 = vld [vmem:[#allocation2 + $0xc8] sm:$0xff]  ;;  %v165_v20 = vld [vmem:[#allocation2 + $0xc0] sm:$0xff]  ;;  %v164_v22 = vld [vmem:[#allocation2 + $0xb8] sm:$0xff] }
  0x13   :  { %201 = vmatpush.msra.mxu1 %v171_v7  ;;  %v147_v23 = vld [vmem:[#allocation2 + $0x30] sm:$0xff]  ;;  %v146_v25 = vld [vmem:[#allocation2 + $0x28] sm:$0xff]  ;;  %v145_v27 = vld [vmem:[#allocation2 + $0x20] sm:$0xff] }
  0x14   :  { %179 = vmatpush.msra.mxu0 %v154_v8  ;;  %294 = vmatpush.msra.mxu3 %v154_v8  ;;  %v163_v24 = vld [vmem:[#allocation2 + $0xb0] sm:$0xff]  ;;  %v162_v26 = vld [vmem:[#allocation2 + $0xa8] sm:$0xff]  ;;  %v161_v28 = vld [vmem:[#allocation2 + $0xa0] sm:$0xff] }
  0x15   :  { %202 = vmatpush.msra.mxu1 %v170_v9  ;;  %v144_v29 = vld [vmem:[#allocation2 + $0x18] sm:$0xff]  ;;  %v143_v31 = vld [vmem:[#allocation2 + $0x10] sm:$0xff]  ;;  %v142_v33 = vld [vmem:[#allocation2 + $0x8] sm:$0xff] }
  0x16   :  { %180 = vmatpush.msra.mxu0 %v153_v10  ;;  %319 = vset.pattern.permute.xlu1 %v408_v11  ;;  %v160_v30 = vld [vmem:[#allocation2 + $0x98] sm:$0xff]  ;;  %v159_v32 = vld [vmem:[#allocation2 + $0x90] sm:$0xff]  ;;  %v158_v34 = vld [vmem:[#allocation2 + $0x88] sm:$0xff] }
  0x17   :  { %317 = vset.pattern.permute.xlu0 %v408_v11  ;;  %88 = vperm.xlu1 %319, %v60_v2   ;;  %v141_v35 = vld [vmem:[#allocation2] sm:$0xff]  ;;  %v240_v37 = vld [vmem:[#allocation5 + $0x78] sm:$0xff]  ;;  %v239_v38 = vld [vmem:[#allocation5 + $0x70] sm:$0xff] }
  0x18   :  { %84 = vperm.xlu0 %317, %v59_v3   ;;  %111 = vperm.xlu2 %320, %v60_v2   ;;  %v157_v36 = vld [vmem:[#allocation2 + $0x80] sm:$0xff]  ;;  %v238_v40 = vld [vmem:[#allocation5 + $0x68] sm:$0xff]  ;;  %v236_v47 = vld [vmem:[#allocation5 + $0x58] sm:$0xff] }
  0x19   :  { %295 = vmatpush.msra.mxu3 %v153_v10  ;;  %203 = vmatpush.msra.mxu1 %v169_v12  ;;  %v237_v43 = vld [vmem:[#allocation5 + $0x60] sm:$0xff]  ;;  %v235_v51 = vld [vmem:[#allocation5 + $0x50] sm:$0xff]  ;;  %v234_v55 = vld [vmem:[#allocation5 + $0x48] sm:$0xff] }
  0x1a   :  { %181 = vmatpush.msra.mxu0 %v152_v13  ;;  %245 = vmatpush.msra.mxu2 %v240_v37  ;;  %v291_v44 = vld [vmem:[%s493_s1 + $0x2] ss:$4 sm:$0x3]  ;;  %v61_v45 = vld [vmem:[%s493_s1] ss:$4 sm:$0x3] }
  0x1b   :  { %296 = vmatpush.msra.mxu3 %v152_v13  ;;  %204 = vmatpush.msra.mxu1 %v168_v14  ;;  %v290_v46 = vld [vmem:[%s493_s1 + $0x1] ss:$4 sm:$0x3]  ;;  %v115_v48 = vperm.slane %v291_v44, 0  ;;  %v73_v49 = vperm.slane %v61_v45, 0  ;;  %v74_v50 = vperm.slane %v61_v45, 1 }
  0x1c   :  { %182 = vmatpush.msra.mxu0 %v151_v15  ;;  %246 = vmatpush.msra.mxu2 %v239_v38  ;;  %v92_v52 = vperm.slane %v290_v46, 0  ;;  %v93_v53 = vperm.slane %v290_v46, 1  ;;  %v116_v54 = vperm.slane %v291_v44, 1  ;;  %v127_v57 = vld [vmem:[%s494_s2] sm:$0x3]  ;;  %v232_v8 = vld [vmem:[#allocation5 + $0x38] sm:$0xff] }
  0x1d   :  { %297 = vmatpush.msra.mxu3 %v151_v15  ;;  %205 = vmatpush.msra.mxu1 %v167_v16  ;;  %v233_v63 = vld [vmem:[#allocation5 + $0x40] sm:$0xff]  ;;  %v129_v6 = vperm.slane %v127_v57, 0  ;;  %v130_v7 = vperm.slane %v127_v57, 1  ;;  %v231_v14 = vld [vmem:[#allocation5 + $0x30] sm:$0xff] }
  0x1e   :  { %183 = vmatpush.msra.mxu0 %v150_v17  ;;  %247 = vmatpush.msra.mxu2 %v238_v40  ;;  %v323_v46 = vld [vmem:[%s498_s6] ss:$0 sm:$0xff] }
  0x1f   :  { %298 = vmatpush.msra.mxu3 %v150_v17  ;;  %206 = vmatpush.msra.mxu1 %v166_v18 }
  0x20   :  { %321 = vset.pattern.permute.xlu0 %v407_v1  ;;  %184 = vmatpush.msra.mxu0 %v149_v19 }
  0x21   :  { %299 = vmatpush.msra.mxu3 %v149_v19  ;;  %207 = vmatpush.msra.mxu1 %v165_v20  ;;  %v230_v19 = vld [vmem:[#allocation5 + $0x28] sm:$0xff] }
  0x22   :  { %185 = vmatpush.msra.mxu0 %v148_v21  ;;  %248 = vmatpush.msra.mxu2 %v237_v43 }
  0x23   :  { %300 = vmatpush.msra.mxu3 %v148_v21  ;;  %208 = vmatpush.msra.mxu1 %v164_v22 }
  0x24   :  { %186 = vmatpush.msra.mxu0 %v147_v23  ;;  %249 = vmatpush.msra.mxu2 %v236_v47 }
  0x25   :  { %301 = vmatpush.msra.mxu3 %v147_v23  ;;  %209 = vmatpush.msra.mxu1 %v163_v24 }
  0x26   :  { %187 = vmatpush.msra.mxu0 %v146_v25  ;;  %250 = vmatpush.msra.mxu2 %v235_v51 }
  0x27   :  { %302 = vmatpush.msra.mxu3 %v146_v25  ;;  %210 = vmatpush.msra.mxu1 %v162_v26 }
  0x28   :  { %188 = vmatpush.msra.mxu0 %v145_v27  ;;  %251 = vmatpush.msra.mxu2 %v234_v55 }
  0x29   :  { %303 = vmatpush.msra.mxu3 %v145_v27  ;;  %211 = vmatpush.msra.mxu1 %v161_v28  ;;  %v229_v27 = vld [vmem:[#allocation5 + $0x20] sm:$0xff] }
  0x2a   :  { %189 = vmatpush.msra.mxu0 %v144_v29  ;;  %252 = vmatpush.msra.mxu2 %v233_v63 }
  0x2b   :  { %304 = vmatpush.msra.mxu3 %v144_v29  ;;  %212 = vmatpush.msra.mxu1 %v160_v30 }
  0x2c   :  { %190 = vmatpush.msra.mxu0 %v143_v31  ;;  %253 = vmatpush.msra.mxu2 %v232_v8 }
  0x2d   :  { %305 = vmatpush.msra.mxu3 %v143_v31  ;;  %213 = vmatpush.msra.mxu1 %v159_v32  ;;  %v228_v31 = vld [vmem:[#allocation5 + $0x18] sm:$0xff]  ;;  %v227_v32 = vld [vmem:[#allocation5 + $0x10] sm:$0xff] }
  0x2e   :  { %191 = vmatpush.msra.mxu0 %v142_v33  ;;  %254 = vmatpush.msra.mxu2 %v231_v14 }
  0x2f   :  { %306 = vmatpush.msra.mxu3 %v142_v33  ;;  %214 = vmatpush.msra.mxu1 %v158_v34  ;;  %v226_v33 = vld [vmem:[#allocation5 + $0x8] sm:$0xff]  ;;  %v225_v34 = vld [vmem:[#allocation5] sm:$0xff] }
  0x30   :  { %192 = vmatpush.msra.mxu0 %v141_v35  ;;  %255 = vmatpush.msra.mxu2 %v230_v19 }
  0x31   :  { %307 = vmatpush.msra.mxu3 %v141_v35  ;;  %215 = vmatpush.msra.mxu1 %v157_v36  ;;  %v322_v35 = vld [vmem:[%s496_s4] ss:$0 sm:$0xff]  ;;  %s409_s4 = smov [#allocation7]  }
  0x32   :  { %256 = vmatpush.msra.mxu2 %v229_v27  ;;  %s274_s24 = sshll.u32 %s409_s4, 4  ;;  %s275_s24 = int_to_ptr.vmem [resolvable:$true] %s274_s24 }
  0x34   :  { %257 = vmatpush.msra.mxu2 %v228_v31 }
  0x36   :  { %258 = vmatpush.msra.mxu2 %v227_v32 }
  0x38   :  { %259 = vmatpush.msra.mxu2 %v226_v33 }
  0x3a   :  { %260 = vmatpush.msra.mxu2 %v225_v34 }
  0x69   :  { %v108_v39 = vpop.permute.xlu2 %107 }
  0x6a   :  { %v119_v58 = vmul.f32 %v115_v48, %v108_v39  ;;  %v120_v4 = vmul.f32 %v116_v54, %v108_v39 }
  0x72   :  { %v112_v56 = vpop.permute.xlu2 %111 }
  0x73   :  { %v121_v9 = vmul.f32 %v115_v48, %v112_v56  ;;  %v122_v23 = vmul.f32 %v116_v54, %v112_v56 }
  0x80   :  { %v70_v42 = vpop.permute.xlu1 %69 }
  0x81   :  { %v65_v41 = vpop.permute.xlu0 %64  ;;  %v79_v0 = vmul.f32 %v73_v49, %v70_v42  ;;  %v80_v13 = vmul.f32 %v74_v50, %v70_v42 }
  0x82   :  { %v77_v59 = vmul.f32 %v73_v49, %v65_v41  ;;  %v78_v60 = vmul.f32 %v74_v50, %v65_v41 }
  0x89   :  { %v89_v61 = vpop.permute.xlu1 %88 }
  0x8a   :  { %v85_v62 = vpop.permute.xlu0 %84  ;;  %v98_v1 = vmul.f32 %v92_v52, %v89_v61  ;;  %v99_v5 = vmul.f32 %v93_v53, %v89_v61 }
  0x8b   :  { %v96_v2 = vmul.f32 %v92_v52, %v85_v62  ;;  %v97_v3 = vmul.f32 %v93_v53, %v85_v62 }
  0x8c   :  { %v102_v10 = vadd.f32 %v98_v1, %v79_v0  ;;  %v103_v18 = vadd.f32 %v99_v5, %v80_v13 }
  0x8d   :  { %v100_v11 = vadd.f32 %v96_v2, %v77_v59  ;;  %v101_v12 = vadd.f32 %v97_v3, %v78_v60 }
  0x8e   :  { %v125_v16 = vadd.f32 %v121_v9, %v102_v10  ;;  %v126_v28 = vadd.f32 %v122_v23, %v103_v18 }
  0x8f   :  { %v123_v15 = vadd.f32 %v119_v58, %v100_v11  ;;  %v124_v17 = vadd.f32 %v120_v4, %v101_v12 }
  0x90   :  { %v135_v21 = vadd.f32 %v129_v6, %v125_v16  ;;  %v136_v29 = vadd.f32 %v130_v7, %v126_v28 }
  0x91   :  { %v133_v20 = vadd.f32 %v129_v6, %v123_v15  ;;  %v134_v22 = vadd.f32 %v130_v7, %v124_v17 }
  0x92   :  { %v139_v25 = vmax.f32 %v135_v21, 0.0  ;;  %v140_v30 = vmax.f32 %v136_v29, 0.0 }
  0x93   :  { %v137_v24 = vmax.f32 %v133_v20, 0.0  ;;  %v138_v26 = vmax.f32 %v134_v22, 0.0 }
  0x94   :  { %196 = vmatmul.f32.vlgmr.msra.gmra.mxu3 %v139_v25 }
  0x95   :  { %193 = vmatmul.f32.vlgmr.msra.gmra.mxu0 %v137_v24  ;;  %216 = vmatmul.f32.vlgmr.msra.gmra.mxu1 %v138_v26 }
  0x9d   :  { %219 = vmatmul.f32.gmra.mxu1 %v140_v30 }
 0x112   :  { %v194_v36 = vpop.f32.mrf.mxu0  ;;  %v217_v38 = vpop.f32.mrf.mxu1 }
 0x113   :  { %v195_v37 = vadd.f32 %v322_v35, %v194_v36 }
 0x115   :  { %v218_v39 = vadd.f32 %v217_v38, %v195_v37 }
 0x117   :  { %v223_v40 = vmax.f32 %v218_v39, 0.0  ;;  %v197_v41 = vpop.f32.mrf.mxu3 }
 0x118   :  { %v198_v42 = vadd.f32 %v322_v35, %v197_v41 }
 0x119   :  { %261 = vmatmul.f32.vlgmr.msra.gmra.mxu2 %v223_v40 }
 0x11a   :  { %v220_v43 = vpop.f32.mrf.mxu1 }
 0x11b   :  { %v221_v44 = vadd.f32 %v220_v43, %v198_v42 }
 0x11d   :  { %v224_v45 = vmax.f32 %v221_v44, 0.0 }
 0x121   :  { %264 = vmatmul.f32.gmra.mxu2 %v224_v45 }
 0x19c   :  { %v262_v47 = vpop.f32.mrf.mxu2 }
 0x19d   :  { %v263_v48 = vadd.f32 %v323_v46, %v262_v47 }
 0x19f   :  { %268 = vst [vmem:[#allocation7] sm:$0xff] %v263_v48 }
 0x1a4   :  { %v265_v49 = vpop.f32.mrf.mxu2 }
 0x1a5   :  { %v266_v50 = vadd.f32 %v323_v46, %v265_v49 }
 0x1a7   :  { %269 = vst [vmem:[#allocation7 + $0x8] sm:$0xff] %v266_v50 }
 0x1a8   :  { %282 = dma.vmem_to_hbm [thread:$0]  %s275_s24, 256, %s277_s27, [#allocation4], %s403_s9, %s403_s9, %s404_s10  }
 0x1a9   :  { %400 = dma.done.wait [#allocation4], 256  }
 0x1aa   :  { %401 = vsyncadd [#allocation4], 4294967040 }
 0x1ab   :  { %287 = vsyncpa [#allocation3], 1 }
 0x1ac   :  { %288 = vsyncpa [#allocation6], 1 }
 0x1ad   :  { %289 = vsyncpa [#allocation4], 1 }

</bundles_post_ra>
